<compile_context>
chip_gen: v6e
topology: v6e:2x2x1
jax: 0.10.0
libtpu: 0.0.40
codegen_flags: <defaults>
</compile_context>

<pallas_src>
import math
import functools

import jax
import jax.numpy as jnp
from jax.experimental import pallas as pl
from jax.experimental.pallas import tpu as pltpu


# ---------------------------------------------------------------------------
# Buffer setup (glue, plain JAX) — mirrors PositionalEncoding.__init__
# ---------------------------------------------------------------------------
def build_pe_table(max_len: int, d_model: int, dtype=jnp.float32) -> jnp.ndarray:
    """Returns pe of shape (1, max_len, d_model), identical to the torch buffer."""
    position = jnp.arange(0, max_len, dtype=jnp.float32)[:, None]              # (L, 1)
    div_term = jnp.exp(
        jnp.arange(0, d_model, 2, dtype=jnp.float32) * (-math.log(10000.0) / d_model)
    )                                                                           # (ceil(D/2),)
    pe = jnp.zeros((max_len, d_model), dtype=jnp.float32)
    pe = pe.at[:, 0::2].set(jnp.sin(position * div_term))
    n_odd = d_model // 2
    pe = pe.at[:, 1::2].set(jnp.cos(position * div_term[:n_odd]))
    return pe[None].astype(dtype)                                               # (1, L, D)


# ---------------------------------------------------------------------------
# Helpers
# ---------------------------------------------------------------------------
def _pick_seq_tile(S: int, D: int, itemsize: int) -> int:
    """Largest seq tile (multiple of 8, <= 512) with tile bytes <= ~2 MiB.

    2 MiB/array * 3 arrays * 2 pipeline buffers = 12 MiB, which fits the default
    scoped VMEM on v5e/v6e/v7x without raising limits.
    """
    target_bytes = 2 * 1024 * 1024
    max_rows = min(512, target_bytes // max(1, D * itemsize))
    max_rows = max(8, (max_rows // 8) * 8)
    if S <= max_rows:
        return S
    for ts in range(max_rows, 7, -8):       # prefer an exact divisor (no ragged edge)
        if S % ts == 0:
            return ts
    return max_rows                          # ragged edge handled by cdiv grid


def _hash_u32(x):
    """lowbias32 integer mixer (uint32 -> uint32); pure VPU ops, lowers everywhere."""
    x = x ^ (x >> 16)
    x = x * jnp.uint32(0x7FEB352D)
    x = x ^ (x >> 15)
    x = x * jnp.uint32(0x846CA68B)
    x = x ^ (x >> 16)
    return x


# ---------------------------------------------------------------------------
# Pallas kernels
# ---------------------------------------------------------------------------
def _add_pe_kernel(x_ref, pe_ref, o_ref):
    # eval mode: y = x + pe (dropout is identity)
    o_ref[...] = (x_ref[...] + pe_ref[...]).astype(o_ref.dtype)


def _add_pe_dropout_kernel(seed_ref, x_ref, pe_ref, o_ref, *,
                           p: float, seq_len: int, d_model: int, ts: int):
    # train mode: y = inverted_dropout(x + pe, p)
    s_i = pl.program_id(0)      # sequence-tile index
    b = pl.program_id(1)        # batch index (innermost grid axis)

    y = x_ref[...] + pe_ref[...]

    # Stateless counter-based RNG: hash of (seed, global element index).
    # Deterministic for a given seed and independent of the tiling.
    shape = x_ref.shape                                                  # (1, TS, D)
    rows = jax.lax.broadcasted_iota(jnp.int32, shape, 1).astype(jnp.uint32)
    cols = jax.lax.broadcasted_iota(jnp.int32, shape, 2).astype(jnp.uint32)
    base_row = (b * seq_len + s_i * ts).astype(jnp.uint32)
    lin = (base_row + rows) * jnp.uint32(d_model) + cols                 # global index
    key = _hash_u32(seed_ref[0].astype(jnp.uint32))
    bits = _hash_u32(lin ^ key)

    threshold = jnp.uint32(int(p * 4294967296.0))                        # P(drop) = p
    keep = bits >= threshold
    scale = 1.0 / (1.0 - p)
    o_ref[...] = jnp.where(keep, y * scale, jnp.zeros_like(y)).astype(o_ref.dtype)


# ---------------------------------------------------------------------------
# Wrapper
# ---------------------------------------------------------------------------
def positional_encoding_forward(x, pe, *, p: float = 0.1, train: bool = False, seed: int = 0):
    """x: (B, S, D); pe: (1, max_len, D) with max_len >= S. Returns (B, S, D)."""
    B, S, D = x.shape
    assert pe.shape[0] == 1 and pe.shape[1] >= S and pe.shape[2] == D

    if train and p >= 1.0:                 # torch: everything dropped
        return jnp.zeros_like(x)

    ts = _pick_seq_tile(S, D, jnp.dtype(x.dtype).itemsize)
    n_s = pl.cdiv(S, ts)
    grid = (n_s, B)                        # batch innermost => PE tile not re-DMA'd per batch

    x_block = (1, ts, D)
    compiler_params = pltpu.CompilerParams(
        dimension_semantics=("parallel", "parallel"),   # megacore-friendly (v7x)
        vmem_limit_bytes=32 * 1024 * 1024,              # safe ceiling on v5e/v6e/v7x
    )

    if (not train) or p == 0.0:
        return pl.pallas_call(
            _add_pe_kernel,
            out_shape=jax.ShapeDtypeStruct(x.shape, x.dtype),
            grid_spec=pltpu.PrefetchScalarGridSpec(
                num_scalar_prefetch=0,
                grid=grid,
                in_specs=[
                    pl.BlockSpec(x_block, lambda s, b: (b, s, 0)),   # x tile
                    pl.BlockSpec(x_block, lambda s, b: (0, s, 0)),   # PE rows from full table
                ],
                out_specs=pl.BlockSpec(x_block, lambda s, b: (b, s, 0)),
            ),
            compiler_params=compiler_params,
        )(x, pe)

    seed_arr = jnp.array([seed], dtype=jnp.int32)
    kernel = functools.partial(_add_pe_dropout_kernel, p=p, seq_len=S, d_model=D, ts=ts)
    return pl.pallas_call(
        kernel,
        out_shape=jax.ShapeDtypeStruct(x.shape, x.dtype),
        grid_spec=pltpu.PrefetchScalarGridSpec(
            num_scalar_prefetch=1,          # seed lives in SMEM
            grid=grid,
            in_specs=[
                pl.BlockSpec(x_block, lambda s, b, seed: (b, s, 0)),
                pl.BlockSpec(x_block, lambda s, b, seed: (0, s, 0)),
            ],
            out_specs=pl.BlockSpec(x_block, lambda s, b, seed: (b, s, 0)),
        ),
        compiler_params=compiler_params,
    )(seed_arr, x, pe)


# ---------------------------------------------------------------------------
# Demo / check
# ---------------------------------------------------------------------------
if __name__ == "__main__":
    B, S, D = 2, 8, 32
    MAX_LEN = 64
    P_DROP = 0.1

    key = jax.random.PRNGKey(0)
    x = jax.random.normal(key, (B, S, D), dtype=jnp.float32)
    pe = build_pe_table(MAX_LEN, D)

    # --- eval mode (dropout = identity): must match the reference exactly ---
    y_eval = jax.block_until_ready(positional_encoding_forward(x, pe, p=P_DROP, train=False))
    y_ref = x + pe[:, :S]
    assert y_eval.shape == (B, S, D)
    assert jnp.allclose(y_eval, y_ref, atol=1e-6, rtol=1e-6), "eval-mode mismatch"

    # --- train mode (inverted dropout, deterministic hash RNG) ---
    y_train = jax.block_until_ready(
        positional_encoding_forward(x, pe, p=P_DROP, train=True, seed=1234)
    )
    assert y_train.shape == (B, S, D)
    kept = y_train != 0.0
    # every surviving element equals (x+pe)/(1-p); dropped elements are exactly 0
    assert jnp.allclose(
        jnp.where(kept, y_train, 0.0),
        jnp.where(kept, y_ref / (1.0 - P_DROP), 0.0),
        atol=1e-5, rtol=1e-5,
    ), "train-mode dropout scaling mismatch"
    keep_frac = float(jnp.mean(kept.astype(jnp.float32)))
    assert 0.6 <= keep_frac <= 0.999, f"dropout keep fraction implausible: {keep_frac}"

    # determinism: same seed -> same mask
    y_train2 = jax.block_until_ready(
        positional_encoding_forward(x, pe, p=P_DROP, train=True, seed=1234)
    )
    assert jnp.array_equal(y_train, y_train2), "dropout not deterministic for fixed seed"

    print("KERNEL_OK")
</pallas_src>

<mosaic_0001>
module attributes {stable_mosaic.version = 11 : i64} {
  func.func @_add_pe_kernel(%arg0: i32, %arg1: i32, %arg2: memref<1x8x32xf32, #tpu.memory_space<vmem>>, %arg3: memref<1x8x32xf32, #tpu.memory_space<vmem>>, %arg4: memref<1x8x32xf32, #tpu.memory_space<vmem>>) attributes {dimension_semantics = [#tpu.dimension_semantics<parallel>, #tpu.dimension_semantics<parallel>], iteration_bounds = array<i64: 1, 2>, scalar_prefetch = 0 : i64, scratch_operands = 0 : i64, tpu.core_type = #tpu.core_type<tc>, window_params = [{transform_indices = @transform_0, window_bounds = array<i64: 1, 8, 32>}, {transform_indices = @transform_1, window_bounds = array<i64: 1, 8, 32>}, {transform_indices = @transform_2, window_bounds = array<i64: 1, 8, 32>}]} {
    %c0 = arith.constant 0 : index
    %c0_0 = arith.constant 0 : index
    %c0_1 = arith.constant 0 : index
    %0 = vector.load %arg2[%c0, %c0_0, %c0_1] : memref<1x8x32xf32, #tpu.memory_space<vmem>>, vector<1x8x32xf32>
    %c0_2 = arith.constant 0 : index
    %c0_3 = arith.constant 0 : index
    %c0_4 = arith.constant 0 : index
    %1 = vector.load %arg3[%c0_2, %c0_3, %c0_4] : memref<1x8x32xf32, #tpu.memory_space<vmem>>, vector<1x8x32xf32>
    %2 = arith.addf %0, %1 : vector<1x8x32xf32>
    %c0_5 = arith.constant 0 : index
    %c0_6 = arith.constant 0 : index
    %c0_7 = arith.constant 0 : index
    %3 = vector.load %arg4[%c0_5, %c0_6, %c0_7] : memref<1x8x32xf32, #tpu.memory_space<vmem>>, vector<1x8x32xf32>
    tpu.vector_store %arg4[%c0_5, %c0_6, %c0_7], %2 {strides = array<i32>} : memref<1x8x32xf32, #tpu.memory_space<vmem>>, vector<1x8x32xf32>,
    return
  }
  func.func @transform_0(%arg0: i32, %arg1: i32) -> (i32, i32, i32) {
    %c0_i32 = arith.constant 0 : i32
    %c0_i32_0 = arith.constant 0 : i32
    return %arg1, %arg0, %c0_i32 : i32, i32, i32
  }
  func.func @transform_1(%arg0: i32, %arg1: i32) -> (i32, i32, i32) {
    %c0_i32 = arith.constant 0 : i32
    %c0_i32_0 = arith.constant 0 : i32
    %c0_i32_1 = arith.constant 0 : i32
    return %c0_i32, %arg0, %c0_i32_0 : i32, i32, i32
  }
  func.func @transform_2(%arg0: i32, %arg1: i32) -> (i32, i32, i32) {
    %c0_i32 = arith.constant 0 : i32
    %c0_i32_0 = arith.constant 0 : i32
    return %arg1, %arg0, %c0_i32 : i32, i32, i32
  }
}

</mosaic_0001>

<bundles_post_ra>
// kernel: tpu_custom_call.1
= control target key start
LH: loop header
LB: loop body
LE: loop exit
PB: predicated region body
PF: predicated region fallthrough
CT: control target
= control target key end

     0   :  { %7 = vsyncpa [#allocation3], 0  ;;  %s550_s0 = inlined_call_operand.vmem [shape: f32[2,8,32], index: 0, kind: input, shape index: {}]   ;;  %s551_s1 = inlined_call_operand.vmem [shape: f32[1,64,32], index: 1, kind: input, shape index: {}]   ;;  %s552_s2 = inlined_call_operand.hbm [shape: f32[2,8,32], index: 2, kind: output, shape index: {}]  }
   0x1   :  { %9 = vsyncpa [#allocation3 + $0x1], 0  ;;  %s448_s9 = smov 0   ;;  %s450_s10 = smov 0  }
   0x2   :  { %s452_s11 = smov 0   ;;  %s454_s12 = smov 0  }
   0x3   :  { %s456_s13 = smov 0   ;;  %s458_s14 = smov 0  }
   0x4 LB: > { %s287_s15 = sadd.s32 4294967295, %s430_s14   ;;  %s288_s16 = sadd.s32 4294967294, %s430_s14   ;;  %s430_s14 = sphi %s458_s14, %s15_s14   ;;  %s426_s13 = sphi %s456_s13, %s559_s13   ;;  %s422_s12 = sphi %s454_s12, %s558_s12   ;;  %s418_s11 = sphi %s452_s11, %s557_s11   ;;  %s414_s10 = sphi %s450_s10, %s556_s10   ;;  %s410_s9 = sphi %s448_s9, %s555_s9  }
   0x5   : > { %s24_s17 = sadd.s32 1, %s426_s13  ;;  %s90_s18 = sadd.s32 1, %s418_s11 }
   0x6   : > { %p25_p0 = scmp.ge.s32.totalorder %s24_s17, 2  ;;  %p100_p1 = scmp.ne.s32.totalorder %s418_s11, %s414_s10 }
   0x7   : > { %p101_p2 = scmp.eq.s32.totalorder %s287_s15, 1  ;;  %p106_p3 = scmp.ne.s32.totalorder %s414_s10, %s410_s9 }
   0x8   : > { %s561_s17 = smov (%p25_p0, %s24_s17), 0  ;;  %p107_p5 = scmp.eq.s32.totalorder %s288_s16, 1 }
   0x9   : > { %p488_p4 = por %p101_p2, %p100_p1  ;;  %s85_s20 = ssub.s32 %s426_s13, %s561_s17 }
   0xa   : > { %p292_p6 = scmp.ge.s32.totalorder %s430_s14, 1  ;;  %p88_p7 = scmp.eq.s32.totalorder %s85_s20, 0 }
   0xb   : > { %p495_p8 = por %p107_p5, %p106_p3  ;;  %p142_p9 = scmp.lt.s32.totalorder %s430_s14, 3 }
   0xc   : > { %s501_s22 = scalar_select %p88_p7, %s418_s11, %s90_s18  }
   0xd   : > { %p143_p10 = pnand %p292_p6, %p142_p9 }
   0xe   : > { %s167_s23 = sand.u32 (!%p143_p10), 1, %s414_s10   ;;  %p170_p11 = scmp.lt.s32.totalorder (!%p143_p10), %s422_s12, 1 }
   0xf   : > { %146 = sbr.rel (%p143_p10) target bundleno = 42 (0x2a), region = 28  ;;  %s293_s24 = sshll.u32 (!%p143_p10), %s167_s23, 3 }
  0x10   : > { %s296_s26 = sshll.u32 (!%p143_p10), %s422_s12, 7  ;;  %s169_s30 = scalar_lea.vmem (!%p143_p10), [#allocation2], %s293_s24 }
  0x11   : > { %s201_s3 = sshll.u32 (!%p143_p10), %s169_s30, 4  ;;  %s199_s15 = scalar_lea.hbm (!%p143_p10), %s552_s2, %s296_s26  ;;  %s202_s3 = int_to_ptr.vmem [resolvable:$true] %s201_s3 }
  0x12   : > { %s354_s16 = scalar_lea.vmem (!%p143_p10), %s202_s3, 128  ;;  %s432_s18 = smov (!%p143_p10), [#allocation2]  }
  0x13   : > { %p355_p12 = scmp.ne.s32.totalorder (!%p143_p10), %s202_s3, %s354_s16  ;;  %s358_s20 = sshll.u32 (!%p143_p10), %s432_s18, 4  ;;  %s359_s20 = int_to_ptr.vmem [resolvable:$false] %s358_s20 }
  0x14   : > { %s171_s25 = scalar_select %p170_p11, %s422_s12, 1  ;;  %v182_v0 = vld [vmem:[%s551_s1] sm:$0xff]  ;;  %vm184_vm0 = vcmask 261120  }
  0x15   : > { %s187_s12 = scalar_lea.sflag [#allocation3], %s167_s23  ;;  %p356_p13 = pnand %p355_p12, %p488_p4 }
  0x16   : > { %s294_s27 = sshll.u32 %s171_s25, 3  ;;  %s360_s24 = scalar_lea.vmem %s359_s20, 256 }
  0x17   : > { %s176_s6 = scalar_lea.vmem %s550_s0, %s294_s27  ;;  %p357_p0 = pneg %p356_p13 }
  0x18   : > { %v181_v1 = vld [vmem:[%s176_s6] sm:$0xff]  ;;  %p361_p1 = scmp.lt.s32.totalorder %s202_s3, %s359_s20  ;;  %p362_p2 = scmp.lt.s32.totalorder %s360_s24, %s354_s16 }
  0x19   : > { %v183_v2 = vadd.f32 %v182_v0, %v181_v1 }
  0x1a   : > { %p363_p3 = por %p362_p2, %p361_p1 }
  0x1b   : > { %185 = vst.msk [vmem:[%s169_s30] sm:$0xff] %vm184_vm0, %v183_v2 }
  0x1c   : > { %p364_p5 = pnand %p363_p3, %p357_p0 }
  0x1e   : > { %367 = shalt.err (!%p364_p5)
}
  0x1f   : > { %s368_s25 = scalar_lea.hbm %s199_s15, 128  ;;  %s372_s27 = scalar_lea.hbm %s552_s2, 256 }
  0x20   : > { %p369_p6 = scmp.ne.s32.totalorder %s199_s15, %s368_s25  ;;  %p373_p10 = scmp.lt.s32.totalorder %s199_s15, %s552_s2 }
  0x21   : > { %p374_p11 = scmp.lt.s32.totalorder %s372_s27, %s368_s25 }
  0x22   : > { %p370_p7 = pnand %p369_p6, %p488_p4 }
  0x23   : > { %p375_p12 = por %p374_p11, %p373_p10 }
  0x24   : > { %p371_p9 = pneg %p370_p7 }
  0x26   : > { %p376_p13 = pnand %p375_p12, %p371_p9 }
  0x28   : > { %379 = shalt.err (!%p376_p13)
}
  0x29   : > { %299 = dma.vmem_to_hbm [thread:$0]  (%p488_p4), %s202_s3, 128, %s199_s15, %s187_s12  }
  0x2a PF: > { %p305_p0 = scmp.ge.s32.totalorder %s430_s14, 2  ;;  %s213_s30 = sand.u32 1, %s410_s9  }
  0x2b   : > { %s214_s4 = scalar_lea.sflag [#allocation3], %s213_s30 }
  0x2c   : > { %p302_p1 = pnand %p305_p0, %p495_p8 }
  0x2e   : > { %p303_p2 = pneg %p302_p1 }
  0x30   : > { %405 = dma.done.wait (%p303_p2), %s214_s4, 128  }
  0x31   : > { %407 = vsyncadd (%p303_p2), %s214_s4, 4294967168  ;;  %s15_s14 = sadd.s32 1, %s430_s14   ;;  %s555_s9 = smov %s414_s10 }
  0x32   : > { %p12_p3 = scmp.ge.s32.totalorder %s15_s14, 4   ;;  %s556_s10 = smov %s418_s11 }
  0x33   : > { %s557_s11 = smov %s501_s22  ;;  %s558_s12 = smov %s426_s13 }
  0x34   : > { %s559_s13 = smov %s561_s17  ;;  %14 = sbr.rel (!%p12_p3) target bundleno = 4 (0x4), region = 66 }
  0x39   :  { %219 = vsyncpa [#allocation3], 1 }
  0x3a   :  { %221 = vsyncpa [#allocation3 + $0x1], 1 }

</bundles_post_ra>
